<compile_context>
chip_gen: v6e
topology: v6e:2x2x1
jax: 0.10.0
libtpu: 0.0.40
codegen_flags: <defaults>
</compile_context>

<pallas_src>
import math
from functools import partial

import numpy as np
import jax
import jax.numpy as jnp
from jax.experimental import pallas as pl
from jax.experimental.pallas import tpu as pltpu

_LANE = 128          # lane width: pad M and D to multiples of this
_ROW_ALIGN = 32      # row padding granularity (int8 native sublane tile)
_NEG = -1.0e30       # plain Python float (a jnp scalar here breaks tracing)


def get_mask(input_size, window_size):
    """Node counts per scale, identical to the reference get_mask."""
    all_size = [input_size]
    for i in range(len(window_size)):
        all_size.append(int(math.floor(all_size[i] / window_size[i])))
    return all_size


def _round_up(x, m):
    return ((x + m - 1) // m) * m


def _fused_adj_kernel(scale_idx_ref, node_ref, hyper_ref, bias_ref, out_ref,
                      *, alpha, beta, k):
    """One row-tile of the binary node->hyperedge incidence for one scale.

    scale_idx_ref : SMEM (n_tiles,) int32 -- consumed by the index_maps only.
    node_ref      : (TILE_N, D_pad)       node embeddings (zero-padded).
    hyper_ref     : (D_pad, M_pad)        this scale's hyperedges, transposed.
    bias_ref      : (1, M_pad)            0 for real columns, -1e30 for pads.
    out_ref       : (TILE_N, M_pad) int8  binary incidence (lane-dense).
    """
    del scale_idx_ref  # only used by the index_maps

    # (TILE_N, D_pad) x (D_pad, M_pad) -> (TILE_N, M_pad), f32 accumulate (MXU)
    a = jax.lax.dot_general(
        node_ref[...], hyper_ref[...], (((1,), (0,)), ((), ())),
        preferred_element_type=jnp.float32)

    # relu(alpha * a); pad columns get a large negative additive bias so they
    # never enter the softmax denominator or the top-k.
    z = jnp.maximum(alpha * a, 0.0) + bias_ref[...]

    # Stable row-softmax pieces.  exp runs once; the divide is eliminated:
    # softmax(z) > beta  <=>  e > beta * denom.
    m = jnp.max(z, axis=1, keepdims=True)        # finite (>= 0) for real rows
    e = jnp.exp(z - m)                           # pad cols underflow to 0

    # Row-sum on the (otherwise idle) MXU: e @ ones gives the denominator
    # replicated across every lane, so no cross-lane reduce and no slicing.
    m_pad = e.shape[1]
    ones_mat = jnp.full((m_pad, m_pad), 1.0, jnp.float32)
    denom = jax.lax.dot_general(e, ones_mat, (((1,), (0,)), ((), ())),
                                preferred_element_type=jnp.float32)

    if beta >= 0.5:
        # Only the (unique) row max can have softmax > beta, and the row max
        # is always inside the top-k (k >= 1), so the top-k passes are dead.
        topk_mask = z >= m
    else:
        # k-th largest z per row via (k-1) max+suppress passes (softmax is
        # monotone in z).  NOTE: exact ties at the k-th value keep more than
        # k entries, unlike torch.topk's lowest-index tie-break.
        kth = m
        work = jnp.where(z >= m, _NEG, z)
        for _ in range(max(k - 1, 0)):
            kth = jnp.max(work, axis=1, keepdims=True)
            work = jnp.where(work >= kth, _NEG, work)
        topk_mask = z >= kth

    keep = jnp.logical_and(topk_mask, e > beta * denom)
    out_ref[...] = keep.astype(jnp.int8)


@partial(jax.jit,
         static_argnames=("alpha", "beta", "k", "tile", "out_slices"))
def fused_adaptive_adjacency(scale_idx, node_cat, hyper_stack, bias_stack, *,
                             alpha, beta, k, tile, out_slices):
    """All scales in one pallas_call; returns per-scale (N, M) int8 slices."""
    total_rows, d_pad = node_cat.shape
    _, _, m_pad = hyper_stack.shape
    n_tiles = total_rows // tile

    adj = pl.pallas_call(
        partial(_fused_adj_kernel, alpha=alpha, beta=beta, k=k),
        out_shape=jax.ShapeDtypeStruct((total_rows, m_pad), jnp.int8),
        grid_spec=pltpu.PrefetchScalarGridSpec(
            num_scalar_prefetch=1,
            grid=(n_tiles,),
            in_specs=[
                # LHS row-tile: block index == grid index (scales padded to
                # tile multiples before concatenation).
                pl.BlockSpec((tile, d_pad), lambda t, sidx: (t, 0)),
                # Per-scale RHS slab, selected via the prefetched SMEM table.
                pl.BlockSpec((None, d_pad, m_pad),
                             lambda t, sidx: (sidx[t], 0, 0)),
                # Per-scale pad-column bias (tiny, replicated across rows).
                pl.BlockSpec((None, 1, m_pad),
                             lambda t, sidx: (sidx[t], 0, 0)),
            ],
            out_specs=pl.BlockSpec((tile, m_pad), lambda t, sidx: (t, 0)),
        ),
        compiler_params=pltpu.CompilerParams(
            dimension_semantics=("parallel",),
            vmem_limit_bytes=32 * 1024 * 1024),
    )(scale_idx, node_cat, hyper_stack, bias_stack)

    # On-device slicing: ship only the real (N, M) bytes to the host.
    return tuple(jax.lax.slice(adj, (off, 0), (off + n, m))
                 for (off, n, m) in out_slices)


class MultiAdaptiveHypergraph:
    """JAX/Pallas re-implementation of multi_adaptive_hypergraoh."""

    def __init__(self, seq_len, window_size, d_model, hyper_num, k, key, *,
                 tile_n=512, matmul_dtype=jnp.bfloat16):
        self.alpha = 3.0
        self.beta = 0.5
        self.k = int(k)
        self.hyper_num = list(hyper_num)
        self.node_num = get_mask(seq_len, window_size)
        n_scales = len(self.hyper_num)

        # nn.Embedding default init is N(0, 1) -> deterministic normal init.
        keys = jax.random.split(key, 2 * n_scales)
        self.embedhy, self.embednod = [], []
        for i in range(n_scales):
            self.embedhy.append(
                jax.random.normal(keys[2 * i], (self.hyper_num[i], d_model),
                                  dtype=jnp.float32))
            self.embednod.append(
                jax.random.normal(keys[2 * i + 1], (self.node_num[i], d_model),
                                  dtype=jnp.float32))

        # ---- Precompute padded / fused kernel operands once (static). ----
        d_pad = _round_up(d_model, _LANE)
        m_pad = _round_up(max(self.hyper_num), _LANE)
        max_n = max(self.node_num[i] for i in range(n_scales))
        tile = min(tile_n, _round_up(max_n, _ROW_ALIGN))

        out_slices, scale_idx = [], []
        row_pad = [_round_up(self.node_num[i], tile) for i in range(n_scales)]
        total_rows = sum(row_pad)

        node_np = np.zeros((total_rows, d_pad), np.float32)
        hyper_np = np.zeros((n_scales, d_pad, m_pad), np.float32)
        bias_np = np.full((n_scales, 1, m_pad), _NEG, np.float32)

        off = 0
        for i in range(n_scales):
            n_i, m_i = self.node_num[i], self.hyper_num[i]
            node_np[off:off + n_i, :d_model] = np.asarray(self.embednod[i])
            hyper_np[i, :d_model, :m_i] = np.asarray(self.embedhy[i]).T
            bias_np[i, 0, :m_i] = 0.0
            out_slices.append((off, n_i, m_i))
            scale_idx += [i] * (row_pad[i] // tile)
            off += row_pad[i]

        self.tile = tile
        self.out_slices = tuple(out_slices)
        self.node_cat = jnp.asarray(node_np).astype(matmul_dtype)
        self.hyper_stack = jnp.asarray(hyper_np).astype(matmul_dtype)
        self.bias_stack = jnp.asarray(bias_np)                 # stays f32
        self.scale_idx = jnp.asarray(np.asarray(scale_idx, np.int32))

    def __call__(self, x):
        del x  # only used for .device placement in the reference

        adj_dev = fused_adaptive_adjacency(
            self.scale_idx, self.node_cat, self.hyper_stack, self.bias_stack,
            alpha=self.alpha, beta=self.beta, k=self.k,
            tile=self.tile, out_slices=self.out_slices)
        adj_dev = jax.block_until_ready(adj_dev)

        hyperedge_all = []
        for adj in adj_dev:
            adj = np.asarray(adj)                    # already (N, M), no pads
            adj = adj[:, adj.any(axis=0)]            # drop empty hyperedges
            # Single vectorized nonzero on adj.T yields (edge, node) pairs in
            # the same column-by-column, ascending-node order as the
            # reference's per-column loop + concatenation.
            edge_idx, node_idx = np.nonzero(adj.T)
            if node_idx.size:
                hypergraph = np.vstack((node_idx.astype(np.int64),
                                        edge_idx.astype(np.int64)))
            else:
                # TODO(synk): the torch reference errors on an all-empty graph
                # (torch.cat of an empty list); we return a (2, 0) array.
                hypergraph = np.zeros((2, 0), dtype=np.int64)
            hyperedge_all.append(hypergraph)
        return hyperedge_all


if __name__ == "__main__":
    # Small config consistent with the module:
    #   seq_len=16, window_size=[2] -> node_num = [16, 8]
    #   hyper_num=[8, 4], d_model=32, k=3
    seq_len = 16
    window_size = [2]
    d_model = 32
    hyper_num = [8, 4]
    k = 3

    key = jax.random.PRNGKey(0)
    pkey, xkey = jax.random.split(key)

    model = MultiAdaptiveHypergraph(seq_len, window_size, d_model,
                                    hyper_num, k, pkey)

    # Input x: (batch, seq_len, d_model); only its device matters in the ref.
    x = jax.random.normal(xkey, (2, seq_len, d_model), dtype=jnp.float32)
    x = jax.block_until_ready(x)

    hypergraphs = model(x)
    assert len(hypergraphs) == len(hyper_num)
    for hg in hypergraphs:
        assert hg.shape[0] == 2

    print("KERNEL_OK")
</pallas_src>

<mosaic_0001>
module attributes {stable_mosaic.version = 11 : i64} {
  func.func @_fused_adj_kernel(%arg0: i32, %arg1: memref<2xi32, #tpu.memory_space<smem>>, %arg2: memref<32x128xbf16, #tpu.memory_space<vmem>>, %arg3: memref<1x128x128xbf16, #tpu.memory_space<vmem>>, %arg4: memref<1x1x128xf32, #tpu.memory_space<vmem>>, %arg5: memref<32x128xi8, #tpu.memory_space<vmem>>) attributes {dimension_semantics = [#tpu.dimension_semantics<parallel>], iteration_bounds = array<i64: 2>, scalar_prefetch = 1 : i64, scratch_operands = 0 : i64, tpu.core_type = #tpu.core_type<tc>, window_params = [{transform_indices = @transform_0, window_bounds = array<i64: 32, 128>}, {transform_indices = @transform_1, window_bounds = array<i64: 1, 128, 128>}, {transform_indices = @transform_2, window_bounds = array<i64: 1, 1, 128>}, {transform_indices = @transform_3, window_bounds = array<i64: 32, 128>}]} {
    %c0 = arith.constant 0 : index
    %c0_0 = arith.constant 0 : index
    %0 = vector.load %arg2[%c0, %c0_0] : memref<32x128xbf16, #tpu.memory_space<vmem>>, vector<32x128xbf16>
    %c0_1 = arith.constant 0 : index
    %c0_2 = arith.constant 0 : index
    %c0_3 = arith.constant 0 : index
    %1 = vector.load %arg3[%c0_1, %c0_2, %c0_3] : memref<1x128x128xbf16, #tpu.memory_space<vmem>>, vector<1x128x128xbf16>
    %2 = vector.shape_cast %1 : vector<1x128x128xbf16> to vector<128x128xbf16>
    %cst = arith.constant dense<0.000000e+00> : vector<32x128xf32>
    %3 = tpu.matmul %0, %2, %cst {dimension_numbers = #tpu.dot_dimension_numbers<[1], [0], [0], [1], [0, 0, 1, 1], [], []>} : vector<32x128xbf16>, vector<128x128xbf16>, vector<32x128xf32> -> vector<32x128xf32>
    %cst_4 = arith.constant 3.000000e+00 : f32
    %4 = vector.broadcast %cst_4 : f32 to vector<32x128xf32>
    %5 = arith.mulf %4, %3 : vector<32x128xf32>
    %cst_5 = arith.constant 0.000000e+00 : f32
    %6 = vector.broadcast %cst_5 : f32 to vector<32x128xf32>
    %7 = arith.maximumf %5, %6 : vector<32x128xf32>
    %c0_6 = arith.constant 0 : index
    %c0_7 = arith.constant 0 : index
    %c0_8 = arith.constant 0 : index
    %8 = vector.load %arg4[%c0_6, %c0_7, %c0_8] : memref<1x1x128xf32, #tpu.memory_space<vmem>>, vector<1x1x128xf32>
    %9 = vector.shape_cast %8 : vector<1x1x128xf32> to vector<1x128xf32>
    %10 = vector.broadcast %9 : vector<1x128xf32> to vector<32x128xf32>
    %11 = arith.addf %7, %10 : vector<32x128xf32>
    %cst_9 = arith.constant dense<0xFF800000> : vector<32xf32>
    %12 = vector.multi_reduction <maximumf>, %11, %cst_9 [1] : vector<32x128xf32> to vector<32xf32>
    %13 = vector.shape_cast %12 : vector<32xf32> to vector<32x1xf32>
    %14 = vector.broadcast %13 : vector<32x1xf32> to vector<32x128xf32>
    %15 = arith.subf %11, %14 : vector<32x128xf32>
    %16 = math.exp %15 : vector<32x128xf32>
    %cst_10 = arith.constant 1.000000e+00 : f32
    %17 = vector.broadcast %cst_10 : f32 to vector<128x128xf32>
    %cst_11 = arith.constant dense<0.000000e+00> : vector<32x128xf32>
    %18 = tpu.matmul %16, %17, %cst_11 {dimension_numbers = #tpu.dot_dimension_numbers<[1], [0], [0], [1], [0, 0, 1, 1], [], []>} : vector<32x128xf32>, vector<128x128xf32>, vector<32x128xf32> -> vector<32x128xf32>
    %19 = vector.broadcast %13 : vector<32x1xf32> to vector<32x128xf32>
    %20 = arith.cmpf oge, %11, %19 : vector<32x128xf32>
    %cst_12 = arith.constant 5.000000e-01 : f32
    %21 = vector.broadcast %cst_12 : f32 to vector<32x128xf32>
    %22 = arith.mulf %21, %18 : vector<32x128xf32>
    %23 = arith.cmpf ogt, %16, %22 : vector<32x128xf32>
    %24 = arith.andi %20, %23 : vector<32x128xi1>
    %25 = arith.extui %24 : vector<32x128xi1> to vector<32x128xi8>
    %c0_13 = arith.constant 0 : index
    %c0_14 = arith.constant 0 : index
    %26 = vector.load %arg5[%c0_13, %c0_14] : memref<32x128xi8, #tpu.memory_space<vmem>>, vector<32x128xi8>
    tpu.vector_store %arg5[%c0_13, %c0_14], %25 {strides = array<i32>} : memref<32x128xi8, #tpu.memory_space<vmem>>, vector<32x128xi8>,
    return
  }
  func.func @transform_0(%arg0: i32, %arg1: memref<2xi32, #tpu.memory_space<smem>>) -> (i32, i32) {
    %c0_i32 = arith.constant 0 : i32
    %c0_i32_0 = arith.constant 0 : i32
    return %arg0, %c0_i32 : i32, i32
  }
  func.func @transform_1(%arg0: i32, %arg1: memref<2xi32, #tpu.memory_space<smem>>) -> (i32, i32, i32) {
    %0 = arith.index_cast %arg0 : i32 to index
    %1 = memref.load %arg1[%0] : memref<2xi32, #tpu.memory_space<smem>>
    %c0_i32 = arith.constant 0 : i32
    %c0_i32_0 = arith.constant 0 : i32
    %c0_i32_1 = arith.constant 0 : i32
    return %1, %c0_i32, %c0_i32_0 : i32, i32, i32
  }
  func.func @transform_2(%arg0: i32, %arg1: memref<2xi32, #tpu.memory_space<smem>>) -> (i32, i32, i32) {
    %0 = arith.index_cast %arg0 : i32 to index
    %1 = memref.load %arg1[%0] : memref<2xi32, #tpu.memory_space<smem>>
    %c0_i32 = arith.constant 0 : i32
    %c0_i32_0 = arith.constant 0 : i32
    %c0_i32_1 = arith.constant 0 : i32
    return %1, %c0_i32, %c0_i32_0 : i32, i32, i32
  }
  func.func @transform_3(%arg0: i32, %arg1: memref<2xi32, #tpu.memory_space<smem>>) -> (i32, i32) {
    %c0_i32 = arith.constant 0 : i32
    %c0_i32_0 = arith.constant 0 : i32
    return %arg0, %c0_i32 : i32, i32
  }
}

</mosaic_0001>

<bundles_post_ra>
// kernel: fused_adaptive_adjacency.1
= control target key start
LH: loop header
LB: loop body
LE: loop exit
PB: predicated region body
PF: predicated region fallthrough
CT: control target
= control target key end

     0   :  { %s997_s15 = smov [#allocation3]   ;;  %s1255_s0 = inlined_call_operand.hbm [shape: s32[2], index: 0, kind: input, shape index: {}]   ;;  %s1256_s1 = inlined_call_operand.hbm [shape: bf16[64,128], index: 1, kind: input, shape index: {}]   ;;  %s1257_s2 = inlined_call_operand.hbm [shape: bf16[2,128,128], index: 2, kind: input, shape index: {}]   ;;  %s1258_s3 = inlined_call_operand.vmem [shape: f32[2,1,128], index: 3, kind: input, shape index: {}]   ;;  %s1259_s4 = inlined_call_operand.vmem [shape: s8[64,128], index: 4, kind: output, shape index: {}]  }
   0x1   :  { %10 = dma.hbm_to_smem %s1255_s0, 16, %s997_s15, [#allocation2] }
   0x2   :  { %959 = dma.done.wait [#allocation2], 16 }
   0x3   :  { %960 = vsyncadd [#allocation2], 4294967280 }
   0x4   :  { %12 = sfence }
   0x5   :  { %13 = vsyncpa [#allocation5], 0 }
   0x6   :  { %15 = vsyncpa [#allocation5 + $0x1], 0 }
   0x7   :  { %16 = vsyncpa [#allocation7], 0 }
   0x8   :  { %18 = vsyncpa [#allocation7 + $0x1], 0  ;;  %s1032_s18 = smov 0   ;;  %s1034_s19 = smov 0  }
   0x9   :  { %s1036_s20 = smov 0   ;;  %s1038_s21 = smov 0  }
   0xa   :  { %s1040_s22 = smov 0   ;;  %s1042_s23 = smov 0  }
   0xb   :  { %s1044_s0 = smov 0  }
   0xc LB: > { %s1066_s24 = sadd.s32 4294967295, %s995_s0   ;;  %s1069_s25 = sadd.s32 1, %s995_s0   ;;  %s995_s0 = sphi %s1044_s0, %s1289_s0   ;;  %s991_s23 = sphi %s1042_s23, %s1288_s23   ;;  %s987_s22 = sphi %s1040_s22, %s1287_s22   ;;  %s983_s21 = sphi %s1038_s21, %s1286_s21   ;;  %s979_s20 = sphi %s1036_s20, %s1285_s20   ;;  %s975_s19 = sphi %s1034_s19, %s1284_s19   ;;  %s971_s18 = sphi %s1032_s18, %s1283_s18  }
   0xd   : > { %s28_s26 = ssub.s32 %s995_s0, %s1069_s25  ;;  %s31_s27 = sadd.s32 1, %s991_s23 }
   0xe   : > { %p29_p0 = scmp.eq.s32.totalorder %s28_s26, 0  ;;  %p38_p1 = scmp.ne.s32.totalorder %s991_s23, %s987_s22 }
   0xf   : > { %p1262_p2 = scmp.eq.s32.totalorder %s995_s0, 0  ;;  %p44_p3 = scmp.ne.s32.totalorder %s987_s22, %s983_s21 }
  0x10   : > { %s1079_s28 = scalar_select %p29_p0, %s991_s23, %s31_s27  }
  0x11   : > { %p40_p4 = por %p1262_p2, %p38_p1  ;;  %p1261_p5 = scmp.eq.s32.totalorder %s1066_s24, 0 }
  0x12   : > { %s1085_s29 = sld [smem:[#allocation3 + %s1069_s25]]  ;;  %p1260_p7 = scmp.lt.s32.totalorder %s995_s0, 2 }
  0x13   : > { %p1089_p6 = por %p1261_p5, %p44_p3  ;;  %s150_s5 = sand.u32 1, %s991_s23  }
  0x14   : > { %s682_s6 = sshll.u32 %s995_s0, 8  ;;  %s658_s7 = sshll.u32 %s150_s5, 4 }
  0x15   : > { %s1266_s30 = scalar_select %p1089_p6, 1, 0 }
  0x16   : > { %s1099_s10 = scalar_lea.hbm %s1256_s1, %s682_s6  ;;  %s154_s11 = scalar_lea.vmem [#allocation4], %s658_s7 }
  0x17   : > { %s161_s12 = sshll.u32 %s154_s11, 4  ;;  %p1103_p8 = pnand %p1260_p7, %p40_p4  ;;  %s1107_s12 = int_to_ptr.vmem [resolvable:$true] %s161_s12 }
  0x18   : > { %s1109_s14 = scalar_lea.sflag [#allocation5], %s150_s5  ;;  %s875_s15 = scalar_lea.hbm %s1099_s10, 256 }
  0x19   : > { %p876_p9 = scmp.ne.s32.totalorder %s1099_s10, %s875_s15  ;;  %p877_p10 = pneg %p1103_p8 }
  0x1a   : > { %s880_s21 = scalar_lea.hbm %s1256_s1, 512  ;;  %p881_p13 = scmp.lt.s32.totalorder %s1099_s10, %s1256_s1 }
  0x1b   : > { %p878_p11 = pnand %p877_p10, %p876_p9  ;;  %p882_p0 = scmp.lt.s32.totalorder %s880_s21, %s875_s15 }
  0x1d   : > { %p879_p12 = pneg %p878_p11  ;;  %p883_p1 = por %p882_p0, %p881_p13 }
  0x1f   : > { %p884_p3 = pnand %p883_p1, %p879_p12 }
  0x21   : > { %887 = shalt.err (!%p884_p3)
}
  0x22   : > { %s888_s5 = scalar_lea.vmem %s1107_s12, 256  ;;  %s998_s6 = smov [#allocation4]  }
  0x23   : > { %p889_p4 = scmp.ne.s32.totalorder %s1107_s12, %s888_s5  ;;  %s893_s7 = sshll.u32 %s998_s6, 4  ;;  %s894_s7 = int_to_ptr.vmem [resolvable:$false] %s893_s7 }
  0x24   : > { %s895_s8 = scalar_lea.vmem %s894_s7, 512  ;;  %p896_p11 = scmp.lt.s32.totalorder %s1107_s12, %s894_s7 }
  0x25   : > { %p891_p7 = pnand %p889_p4, %p877_p10  ;;  %p897_p5 = scmp.lt.s32.totalorder %s895_s8, %s888_s5 }
  0x27   : > { %p892_p9 = pneg %p891_p7  ;;  %p898_p2 = por %p897_p5, %p896_p11 }
  0x29   : > { %p899_p6 = pnand %p898_p2, %p892_p9 }
  0x2b   : > { %902 = shalt.err (!%p899_p6)
}
  0x2c   : > { %s1264_s9 = smov 64   ;;  %s1000_s11 = smov 4  }
  0x2d   : > { %781 = dma.hbm_to_vmem [thread:$0]  (!%p1103_p8), %s1099_s10, 256, %s1107_s12, %s1109_s14, %s1264_s9, %s1264_s9, %s1000_s11  }
  0x2e   : > { %p664_p2 = scmp.ge.s32.totalorder %s995_s0, 1  ;;  %p199_p5 = scmp.lt.s32.totalorder %s995_s0, 3 }
  0x2f   : > { %s54_s16 = sld [smem:[#allocation3 + %s995_s0]]  ;;  %p66_p7 = scmp.ne.s32.totalorder %s979_s20, %s975_s19 }
  0x30   : > { %p1135_p6 = pnand %p664_p2, %p199_p5  ;;  %p72_p10 = scmp.ne.s32.totalorder %s975_s19, %s971_s18 }
  0x31   : > { %s171_s17 = sand.u32 1, %s979_s20   ;;  %p1269_p12 = scmp.eq.s32.totalorder %s995_s0, 0 }
  0x32   : > { %s1268_s15 = scalar_select %p1135_p6, 1, 0 }
  0x33   : > { %p68_p13 = por %p66_p7, %p1269_p12  ;;  %p1270_p0 = scmp.eq.s32.totalorder %s1066_s24, 0 }
  0x34   : > { %s59_s10 = sadd.s32 1, %s979_s20  ;;  %s661_s14 = sshll.u32 %s171_s17, 6 }
  0x35   : > { %p1149_p1 = por %p72_p10, %p1270_p0  ;;  %s56_s12 = ssub.s32 %s54_s16, %s1085_s29 }
  0x36   : > { %p57_p8 = scmp.eq.s32.totalorder %s56_s12, 0  ;;  %p1272_p3 = scmp.lt.s32.totalorder %s995_s0, 2 }
  0x37   : > { %s1271_s13 = scalar_select %p1149_p1, 1, 0 }
  0x38   : > { %p1157_p4 = pnand %p1272_p3, %p68_p13  ;;  %p1274_p9 = pmov %p1272_p3 }
  0x39   : > { %s773_s26 = scalar_select %p68_p13, [#allocation3], [#allocation8] }
  0x3a   : > { %s1162_s18 = scalar_select %p57_p8, %s979_s20, %s59_s10  }
  0x3b   : > { %s774_s27 = scalar_select %p68_p13, %s995_s0, 0 }
  0x3c   : > { %s1291_s26 = smov (!%p1274_p9, %s773_s26), [#allocation9]  ;;  %p1275_p11 = pmov %p1272_p3 }
  0x3d   : > { %s175_s6 = scalar_lea.vmem [#allocation6], %s661_s14  ;;  %s1176_s10 = scalar_lea.sflag [#allocation7], %s171_s17 }
  0x3e   : > { %s1293_s27 = smov (!%p1275_p11, %s774_s27), 0  ;;  %s183_s7 = sshll.u32 %s175_s6, 4  ;;  %s1169_s7 = int_to_ptr.vmem [resolvable:$true] %s183_s7 }
  0x3f   : > { %s176_s5 = sld [smem:[%s1291_s26 + %s1293_s27]]  ;;  %p905_p5 = pneg %p1157_p4 }
  0x40   : > { %s908_s26 = scalar_lea.hbm %s1257_s2, 2048 }
  0x45   : > { %s683_s29 = sshll.u32 %s176_s5, 10 }
  0x46   : > { %s1174_s12 = scalar_lea.hbm %s1257_s2, %s683_s29 }
  0x47   : > { %s903_s9 = scalar_lea.hbm %s1174_s12, 1024  ;;  %p909_p12 = scmp.lt.s32.totalorder %s1174_s12, %s1257_s2 }
  0x48   : > { %p904_p2 = scmp.ne.s32.totalorder %s1174_s12, %s903_s9  ;;  %p910_p13 = scmp.lt.s32.totalorder %s908_s26, %s903_s9 }
  0x4a   : > { %p906_p7 = pnand %p905_p5, %p904_p2  ;;  %p911_p0 = por %p910_p13, %p909_p12 }
  0x4c   : > { %p907_p10 = pneg %p906_p7 }
  0x4e   : > { %p912_p8 = pnand %p911_p0, %p907_p10 }
  0x50   : > { %915 = shalt.err (!%p912_p8)
}
  0x51   : > { %s916_s17 = scalar_lea.vmem %s1169_s7, 1024  ;;  %s1001_s6 = smov [#allocation6]  }
  0x52   : > { %p917_p3 = scmp.ne.s32.totalorder %s1169_s7, %s916_s17  ;;  %s921_s29 = sshll.u32 %s1001_s6, 4  ;;  %s922_s29 = int_to_ptr.vmem [resolvable:$false] %s921_s29 }
  0x53   : > { %s923_s8 = scalar_lea.vmem %s922_s29, 2048  ;;  %p924_p2 = scmp.lt.s32.totalorder %s1169_s7, %s922_s29 }
  0x54   : > { %p919_p9 = pnand %p917_p3, %p905_p5  ;;  %p925_p7 = scmp.lt.s32.totalorder %s923_s8, %s916_s17 }
  0x56   : > { %p920_p11 = pneg %p919_p9  ;;  %p926_p1 = por %p925_p7, %p924_p2 }
  0x58   : > { %p927_p6 = pnand %p926_p1, %p920_p11 }
  0x5a   : > { %930 = shalt.err (!%p927_p6)
}
  0x5b   : > { %s1276_s9 = smov 64   ;;  %p1277_p5 = scmp.ne.s32.totalorder %s1268_s15, 0 }
  0x5c   : > { %786 = dma.hbm_to_vmem [thread:$0]  (!%p1157_p4), %s1174_s12, 1024, %s1169_s7, %s1176_s10, %s1276_s9, %s1276_s9, %s1000_s11  }
  0x5d   : > { %203 = sbr.rel (%p1277_p5) target bundleno = 711 (0x2c7), region = 32  ;;  %s205_s16 = sand.u32 (!%p1277_p5), 1, %s987_s22  }
  0x5e   : > { %s1203_s0 = sshll.u32 (!%p1277_p5), %s205_s16, 4  ;;  %s206_s14 = scalar_lea.sflag (!%p1277_p5), [#allocation5], %s205_s16 }
  0x5f   : > { %s209_s26 = scalar_lea.vmem (!%p1277_p5), [#allocation4], %s1203_s0  ;;  %p1278_p6 = scmp.ne.s32.totalorder (!%p1277_p5), %s1266_s30, 0 }
  0x62   : > { %962 = dma.done.wait (%p1278_p6), %s206_s14, 256  }
  0x63   : > { %964 = vsyncadd (%p1278_p6), %s206_s14, 4294967040  ;;  %s214_s21 = sand.u32 1, %s975_s19   ;;  %p1279_p1 = scmp.ne.s32.totalorder %s1271_s13, 0 }
  0x64   : > { %s666_s11 = sshll.u32 %s214_s21, 6  ;;  %s215_s7 = scalar_lea.sflag [#allocation7], %s214_s21 }
  0x65   : > { %s218_s15 = scalar_lea.vmem [#allocation6], %s666_s11 }
  0x66   : > { %966 = dma.done.wait (%p1279_p1), %s215_s7, 1024  }
  0x67   : > { %968 = vsyncadd (%p1279_p1), %s215_s7, 4294966272  ;;  %v849_v0 = vld [vmem:[%s218_s15 + $0x38] sm:$0xff]   ;;  %v850_v1 = vld [vmem:[%s218_s15 + $0x30] sm:$0xff]   ;;  %v1002_v10 = vmov 1.0   ;;  %s252_s30 = sld [smem:[#allocation3 + %s1066_s24]]  ;;  %s667_s27 = sshll.u32 %s1066_s24, 2 }
  0x68   : > { %714 = vmatprep.subr.bf16.mxu0 %v849_v0  ;;  %v851_v2 = vld [vmem:[%s218_s15 + $0x28] sm:$0xff]   ;;  %v852_v3 = vld [vmem:[%s218_s15 + $0x20] sm:$0xff]   ;;  %v853_v5 = vld [vmem:[%s218_s15 + $0x18] sm:$0xff]   ;;  %734 = vmatprep.subr.mxu1 %v1002_v10  ;;  %p258_p10 = scmp.lt.s32.totalorder %s667_s27, 7  ;;  %v1003_v53 = vmov 0  }
  0x69   : > { %715 = vmatpush3.bf16.msra.mxu0 %v849_v0  ;;  %v857_v4 = vld [vmem:[%s209_s26] sm:$0xff]   ;;  %v855_v7 = vld [vmem:[%s218_s15 + $0x8] sm:$0xff]   ;;  %735 = vmatpush3.msra.mxu1 %v1002_v10 }
  0x6a   : > { %716 = vmatprep.subr.bf16.mxu0 %v850_v1  ;;  %730 = vmatprep.mubr.bf16.mxu0 %v857_v4  ;;  %v854_v6 = vld [vmem:[%s218_s15 + $0x10] sm:$0xff]   ;;  %v856_v8 = vld [vmem:[%s218_s15] sm:$0xff]   ;;  %v858_v9 = vld [vmem:[%s209_s26 + $0x8] sm:$0xff]   ;;  %s1297_s27 = smov (!%p258_p10, %s667_s27), 7 }
  0x6b   : > { %736 = vmatprep.subr.mxu1 %v1002_v10  ;;  %s668_s24 = sshll.u32 %s1297_s27, 1 }
  0x6c   : > { %737 = vmatpush3.msra.mxu1 %v1002_v10  ;;  %s261_s6 = scalar_lea.vmem %s1259_s4, %s668_s24 }
  0x6d   : > { %717 = vmatpush3.bf16.msra.mxu0 %v850_v1  ;;  %738 = vmatprep.subr.mxu1 %v1002_v10  ;;  %p253_p4 = scmp.lt.s32.totalorder %s252_s30, 1 }
  0x6e   : > { %718 = vmatprep.subr.bf16.mxu0 %v851_v2  ;;  %739 = vmatpush3.msra.mxu1 %v1002_v10 }
  0x6f   : > { %740 = vmatprep.subr.mxu1 %v1002_v10  ;;  %s1295_s30 = smov (!%p253_p4, %s252_s30), 1 }
  0x70   : > { %741 = vmatpush3.msra.mxu1 %v1002_v10  ;;  %s255_s10 = scalar_lea.vmem %s1258_s3, %s1295_s30 }
  0x71   : > { %719 = vmatpush3.bf16.msra.mxu0 %v851_v2  ;;  %742 = vmatprep.subr.mxu1 %v1002_v10  ;;  %v679_v13 = vld [vmem:[%s255_s10] ss:$0 sm:$0xff] }
  0x72   : > { %720 = vmatprep.subr.bf16.mxu0 %v852_v3  ;;  %743 = vmatpush3.msra.mxu1 %v1002_v10 }
  0x73   : > { %744 = vmatprep.subr.mxu1 %v1002_v10 }
  0x74   : > { %745 = vmatpush3.msra.mxu1 %v1002_v10 }
  0x75   : > { %721 = vmatpush3.bf16.msra.mxu0 %v852_v3  ;;  %746 = vmatprep.subr.mxu1 %v1002_v10 }
  0x76   : > { %722 = vmatprep.subr.bf16.mxu0 %v853_v5  ;;  %747 = vmatpush3.msra.mxu1 %v1002_v10 }
  0x77   : > { %748 = vmatprep.subr.mxu1 %v1002_v10 }
  0x78   : > { %749 = vmatpush3.msra.mxu1 %v1002_v10 }
  0x79   : > { %723 = vmatpush3.bf16.msra.mxu0 %v853_v5  ;;  %750 = vmatprep.subr.mxu1 %v1002_v10 }
  0x7a   : > { %724 = vmatprep.subr.bf16.mxu0 %v854_v6  ;;  %751 = vmatpush3.msra.mxu1 %v1002_v10 }
  0x7b   : > { %752 = vmatprep.subr.mxu1 %v1002_v10 }
  0x7c   : > { %753 = vmatpush3.msra.mxu1 %v1002_v10 }
  0x7d   : > { %725 = vmatpush3.bf16.msra.mxu0 %v854_v6  ;;  %754 = vmatprep.subr.mxu1 %v1002_v10 }
  0x7e   : > { %726 = vmatprep.subr.bf16.mxu0 %v855_v7  ;;  %755 = vmatpush3.msra.mxu1 %v1002_v10 }
  0x7f   : > { %756 = vmatprep.subr.mxu1 %v1002_v10 }
  0x80   : > { %757 = vmatpush3.msra.mxu1 %v1002_v10 }
  0x81   : > { %727 = vmatpush3.bf16.msra.mxu0 %v855_v7  ;;  %758 = vmatprep.subr.mxu1 %v1002_v10 }
  0x82   : > { %728 = vmatprep.subr.bf16.mxu0 %v856_v8  ;;  %759 = vmatpush3.msra.mxu1 %v1002_v10 }
  0x83   : > { %760 = vmatprep.subr.mxu1 %v1002_v10 }
  0x84   : > { %761 = vmatpush3.msra.mxu1 %v1002_v10 }
  0x85   : > { %729 = vmatpush3.bf16.msra.mxu0 %v856_v8  ;;  %762 = vmatprep.subr.mxu1 %v1002_v10 }
  0x86   : > { %763 = vmatpush3.msra.mxu1 %v1002_v10 }
  0x87   : > { %764 = vmatprep.subr.mxu1 %v1002_v10 }
  0x88   : > { %731 = vmatmul.mubr.bf16.vlgmr.msra.gmra.mxu0 %v858_v9  ;;  %765 = vmatpush3.msra.mxu1 %v1002_v10 }
 0x148   : > { %v732_v11 = vpop.f32.mrf.mxu0 }
 0x149   : > { %v397_v12 = vmul.f32 3.0, %v732_v11 }
 0x14a   : > { %v380_v14 = vpop.f32.mrf.mxu0 }
 0x14b   : > { %v401_v15 = vmax.f32 %v397_v12, 0.0  ;;  %v395_v16 = vmul.f32 3.0, %v380_v14 }
 0x14c   : > { %v733_v17 = vpop.f32.mrf.mxu0 }
 0x14d   : > { %v412_v18 = vadd.f32 %v679_v13, %v401_v15  ;;  %v399_v19 = vmax.f32 %v395_v16, 0.0  ;;  %v398_v20 = vmul.f32 3.0, %v733_v17 }
 0x14e   : > { %v383_v21 = vpop.f32.mrf.mxu0 }
 0x14f   : > { %v410_v22 = vadd.f32 %v679_v13, %v399_v19  ;;  %v402_v23 = vmax.f32 %v398_v20, 0.0  ;;  %v396_v24 = vmul.f32 3.0, %v383_v21  ;;  %418 = vmax.xlane.f32.xlu1 %v412_v18 }
 0x151   : > { %v413_v25 = vadd.f32 %v679_v13, %v402_v23  ;;  %v400_v26 = vmax.f32 %v396_v24, 0.0  ;;  %414 = vmax.xlane.f32.xlu0 %v410_v22 }
 0x153   : > { %v411_v27 = vadd.f32 %v679_v13, %v400_v26  ;;  %420 = vmax.xlane.f32.xlu1 %v413_v25 }
 0x155   : > { %416 = vmax.xlane.f32.xlu0 %v411_v27 }
 0x1d8   : > { %v419_v28 = vpop.xlane.xlu1 %418 }
 0x1d9   : > { %v424_v31 = vsub.f32 %v412_v18, %v419_v28  ;;  %vm521_vm9 = vcmp.ge.f32.partialorder %v412_v18, %v419_v28 }
 0x1da   : > { %v415_v29 = vpop.xlane.xlu0 %414 }
 0x1db   : > { %v422_v30 = vsub.f32 %v410_v22, %v415_v29  ;;  %v430_v37 = vmul.f32 1.442695, %v424_v31  ;;  %vm519_vm2 = vcmp.ge.f32.partialorder %v410_v22, %v415_v29 }
 0x1dc   : > { %v421_v32 = vpop.xlane.xlu1 %420 }
 0x1dd   : > { %v426_v33 = vmul.f32 1.442695, %v422_v30  ;;  %v425_v35 = vsub.f32 %v413_v25, %v421_v32  ;;  %vm522_vm8 = vcmp.ge.f32.partialorder %v413_v25, %v421_v32 }
 0x1de   : > { %v417_v34 = vpop.xlane.xlu0 %416 }
 0x1df   : > { %859 = vpow2.f32 %v426_v33  ;;  %v423_v36 = vsub.f32 %v411_v27, %v417_v34  ;;  %v432_v39 = vmul.f32 1.442695, %v425_v35  ;;  %vm520_vm1 = vcmp.ge.f32.partialorder %v411_v27, %v417_v34 }
 0x1e1   : > { %v428_v38 = vmul.f32 1.442695, %v423_v36 }
 0x1e3   : > { %861 = vpow2.f32 %v428_v38 }
 0x1e4   : > { %863 = vpow2.f32 %v430_v37 }
 0x1e5   : > { %865 = vpow2.f32 %v432_v39 }
 0x1ec   : > { %v860_v40 = vpop.eup %859 }
 0x1ed   : > { %766 = vmatprep.mubr.f32.mxu1 %v860_v40 }
 0x1f0   : > { %v862_v41 = vpop.eup %861 }
 0x1f1   : > { %v864_v42 = vpop.eup %863  ;;  %767 = vmatmul.mubr.f32.vlgmr.msra.gmra.mxu1 %v862_v41 }
 0x1f2   : > { %769 = vmatprep.mubr.f32.mxu1 %v864_v42  ;;  %v866_v43 = vpop.eup %865 }
 0x1f5   : > { %770 = vmatmul.mubr.f32.gmra.mxu1 %v866_v43 }
 0x2b1   : > { %v768_v44 = vpop.f32.mrf.mxu1 }
 0x2b2   : > { %v524_v45 = vmul.f32 0.5, %v768_v44 }
 0x2b3   : > { %v500_v46 = vpop.f32.mrf.mxu1 }
 0x2b4   : > { %vm528_vm0 = vcmp.gt.f32.partialorder %v862_v41, %v524_v45  ;;  %v523_v47 = vmul.f32 0.5, %v500_v46 }
 0x2b5   : > { %v771_v48 = vpop.f32.mrf.mxu1  ;;  %vm1224_vm3 = vmand %vm520_vm1, %vm528_vm0 }
 0x2b6   : > { %vm527_vm4 = vcmp.gt.f32.partialorder %v860_v40, %v523_v47  ;;  %v526_v50 = vmul.f32 0.5, %v771_v48 }
 0x2b7   : > { %vm531_vm5 = vmand %vm519_vm2, %vm527_vm4  ;;  %v510_v51 = vpop.f32.mrf.mxu1 }
 0x2b8   : > { %vm535_vm6 = vmpackc.low %vm1224_vm3, %vm531_vm5  ;;  %vm530_vm7 = vcmp.gt.f32.partialorder %v866_v43, %v526_v50  ;;  %v525_v52 = vmul.f32 0.5, %v510_v51 }
 0x2b9   : > { %vm534_vm10 = vmand %vm522_vm8, %vm530_vm7 }
 0x2ba   : > { %vm529_vm11 = vcmp.gt.f32.partialorder %v864_v42, %v525_v52 }
 0x2bb   : > { %vm533_vm12 = vmand %vm521_vm9, %vm529_vm11 }
 0x2bc   : > { %vm536_vm13 = vmpackc.low %vm534_vm10, %vm533_vm12 }
 0x2bd   : > { %vm537_vm14 = vmpackc.even %vm536_vm13, %vm535_vm6 }
 0x2be   : > { %v538_v54 = vsel %vm537_vm14, 16843009, %v1003_v53 }
 0x2bf   : > { %v539_v55 = vunpack.c.0.s8 %v538_v54  ;;  %v540_v56 = vunpack.c.1.s8 %v538_v54  ;;  %v541_v57 = vunpack.c.2.s8 %v538_v54  ;;  %v542_v58 = vunpack.c.3.s8 %v538_v54 }
 0x2c1   : > { %v543_v59 = vpack.c.b16 %v539_v55, %v539_v55  ;;  %v545_v60 = vpack.c.b16 %v540_v56, %v540_v56  ;;  %v547_v61 = vpack.c.b16 %v541_v57, %v541_v57  ;;  %v549_v62 = vpack.c.b16 %v542_v58, %v542_v58 }
 0x2c3   : > { %v544_v63 = vpack.c.b8 %v543_v59, %v543_v59  ;;  %v546_v0 = vpack.c.b8 %v545_v60, %v545_v60  ;;  %v548_v1 = vpack.c.b8 %v547_v61, %v547_v61  ;;  %v550_v2 = vpack.c.b8 %v549_v62, %v549_v62 }
 0x2c5   : > { %551 = vst [vmem:[%s261_s6] sm:$0x3] %v544_v63  ;;  %552 = vst [vmem:[%s261_s6 + $0x2] sm:$0x3] %v546_v0 }
 0x2c6   : > { %553 = vst [vmem:[%s261_s6 + $0x4] sm:$0x3] %v548_v1  ;;  %554 = vst [vmem:[%s261_s6 + $0x6] sm:$0x3] %v550_v2 }
 0x2c7 PF: > { %s1282_s29 = smov %s1162_s18  ;;  %p21_p12 = scmp.ge.s32.totalorder %s1069_s25, 4  }
 0x2c8   : > { %s1283_s18 = smov %s975_s19  ;;  %s1284_s19 = smov %s979_s20 }
 0x2c9   : > { %s1285_s20 = smov %s1282_s29  ;;  %s1286_s21 = smov %s987_s22 }
 0x2ca   : > { %s1287_s22 = smov %s991_s23  ;;  %s1288_s23 = smov %s1079_s28 }
 0x2cb   : > { %s1289_s0 = smov %s1069_s25  ;;  %23 = sbr.rel (!%p21_p12) target bundleno = 12 (0xc), region = 88 }
 0x2d0   :  { %577 = vsyncpa [#allocation5], 1 }
 0x2d1   :  { %579 = vsyncpa [#allocation5 + $0x1], 1 }
 0x2d2   :  { %580 = vsyncpa [#allocation7], 1 }
 0x2d3   :  { %582 = vsyncpa [#allocation7 + $0x1], 1 }

</bundles_post_ra>
